<compile_context>
chip_gen: v7x
topology: tpu7x:2x2x1
jax: 0.10.0
libtpu: 0.0.40
codegen_flags: <defaults>
</compile_context>

<pallas_src>
import functools

import jax
import jax.numpy as jnp
from jax import lax
from jax.experimental import pallas as pl
from jax.experimental.pallas import tpu as pltpu

_LANE = 128
_SUBLANE = 8


def _ls_ce_kernel(x_ref, t_ref, out_ref, *, n_total, smoothing):
    # x_ref:   (tile_n, C) logits tile in VMEM (native dtype)
    # t_ref:   (tile_n, 1) int32 class indices tile in VMEM
    # out_ref: (1, 8, 128) f32 per-tile partial sum (scalar replicated)
    pid = pl.program_id(0)

    x = x_ref[...].astype(jnp.float32)                     # (tile_n, C)
    tn, c = x.shape
    t = t_ref[...]                                         # (tile_n, 1) int32

    # Per-row logsumexp (two cross-lane reductions).
    m = jnp.max(x, axis=-1, keepdims=True)                 # (tile_n, 1)
    z = m + jnp.log(jnp.sum(jnp.exp(x - m), axis=-1, keepdims=True))

    # Fused weighted reduction (one cross-lane reduction):
    #   row_loss = z - sum_j [ s/C + (1-s)*1{j==t_n} ] * x_j
    one_minus_s = jnp.float32(1.0 - smoothing)
    s_over_c = jnp.float32(smoothing / c)
    col_ids = lax.broadcasted_iota(jnp.int32, (tn, c), 1)
    w = jnp.where(col_ids == t, one_minus_s + s_over_c, s_over_c)
    row_loss = z - jnp.sum(w * x, axis=-1, keepdims=True)  # (tile_n, 1)

    # Mask rows past the true batch size (partial last tile reads garbage).
    row_ids = pid * tn + lax.broadcasted_iota(jnp.int32, (tn, 1), 0)
    row_loss = jnp.where(row_ids < n_total, row_loss, 0.0)

    part = jnp.sum(row_loss)
    # Lane-dense, unmasked full-block store; wrapper reads [:, 0, 0].
    out_ref[...] = jnp.full((1, _SUBLANE, _LANE), part, dtype=jnp.float32)


def _vmem_plan():
    """Generation-aware (per-buffer budget, scoped VMEM limit) in bytes."""
    cap = None
    try:
        cap = int(pltpu.get_tpu_info().vmem_capacity_bytes)
    except Exception:
        cap = None
    if cap is not None and cap >= 96 * 1024 * 1024:
        # v5e / v6e: 128 MiB physical VMEM per TensorCore.
        return 12 * 1024 * 1024, 64 * 1024 * 1024
    # v7x (64 MiB per TensorCore) or unknown generation: stay conservative.
    return 5 * 1024 * 1024, 48 * 1024 * 1024


def _choose_tile_n(n, c, itemsize, per_buffer_budget):
    # Packed sublane multiple for the input dtype: 8 f32, 16 bf16, 32 int8/fp8.
    sub = max(_SUBLANE, 32 // max(1, itemsize))
    # VMEM bytes per batch row per pipeline buffer:
    #   logits row (c * itemsize) + (tile_n, 1) int32 targets padded to 128 lanes.
    per_row = c * itemsize + _LANE * 4
    t = per_buffer_budget // per_row
    t = max(sub, (t // sub) * sub)
    n_pad = ((n + sub - 1) // sub) * sub
    return min(t, n_pad)


def label_smoothing_cross_entropy(inputs, targets, smoothing=0.1):
    """inputs: (N, C) logits (any float dtype); targets: (N,) int class ids."""
    n, c = inputs.shape
    targets2d = targets.astype(jnp.int32).reshape(n, 1)

    itemsize = jnp.dtype(inputs.dtype).itemsize
    per_buffer_budget, vmem_limit = _vmem_plan()
    tile_n = _choose_tile_n(n, c, itemsize, per_buffer_budget)
    num_tiles = pl.cdiv(n, tile_n)

    kernel = functools.partial(
        _ls_ce_kernel, n_total=n, smoothing=float(smoothing))

    cost = pl.CostEstimate(
        flops=6 * n * c,
        transcendentals=n * c,
        bytes_accessed=n * c * itemsize + n * 4
        + num_tiles * _SUBLANE * _LANE * 4,
    )

    partials = pl.pallas_call(
        kernel,
        out_shape=jax.ShapeDtypeStruct((num_tiles, _SUBLANE, _LANE), jnp.float32),
        grid_spec=pltpu.PrefetchScalarGridSpec(
            num_scalar_prefetch=0,
            grid=(num_tiles,),
            in_specs=[
                pl.BlockSpec((tile_n, c), lambda i: (i, 0)),
                pl.BlockSpec((tile_n, 1), lambda i: (i, 0)),
            ],
            out_specs=pl.BlockSpec((1, _SUBLANE, _LANE), lambda i: (i, 0, 0)),
        ),
        compiler_params=pltpu.CompilerParams(
            dimension_semantics=("parallel",),
            vmem_limit_bytes=vmem_limit,
        ),
        cost_estimate=cost,
    )(inputs, targets2d)

    # Final reduction over per-tile partials + mean over the batch.
    return jnp.sum(partials[:, 0, 0]) * jnp.float32(1.0 / n)


def _reference(inputs, targets, smoothing=0.1):
    log_probs = jax.nn.log_softmax(inputs.astype(jnp.float32), axis=-1)
    onehot = jax.nn.one_hot(targets, inputs.shape[1], dtype=jnp.float32)
    smoothed = (1.0 - smoothing) * onehot + smoothing / inputs.shape[1]
    return jnp.sum(jnp.mean(-smoothed * log_probs, axis=0))


if __name__ == "__main__":
    key = jax.random.PRNGKey(0)

    # Case 1: small classifier-head shape.
    k1, k2, k3, k4 = jax.random.split(key, 4)
    N1, C1 = 8, 32
    x1 = jax.random.normal(k1, (N1, C1), dtype=jnp.float32)
    t1 = jax.random.randint(k2, (N1,), 0, C1, dtype=jnp.int32)
    loss1 = jax.block_until_ready(label_smoothing_cross_entropy(x1, t1, 0.1))
    ref1 = _reference(x1, t1, 0.1)
    assert jnp.allclose(loss1, ref1, atol=1e-5, rtol=1e-5), (loss1, ref1)

    # Case 2: ragged shapes (non-multiple-of-8 batch, non-multiple-of-128
    # classes) to exercise partial-tile masking.
    N2, C2 = 13, 257
    x2 = jax.random.normal(k3, (N2, C2), dtype=jnp.float32)
    t2 = jax.random.randint(k4, (N2,), 0, C2, dtype=jnp.int32)
    loss2 = jax.block_until_ready(label_smoothing_cross_entropy(x2, t2, 0.1))
    ref2 = _reference(x2, t2, 0.1)
    assert jnp.allclose(loss2, ref2, atol=1e-5, rtol=1e-5), (loss2, ref2)

    print("KERNEL_OK")
</pallas_src>

<mosaic_0001>
module attributes {stable_mosaic.version = 11 : i64} {
  func.func @_ls_ce_kernel(%arg0: i32, %arg1: memref<8x32xf32, #tpu.memory_space<vmem>>, %arg2: memref<8x1xi32, #tpu.memory_space<vmem>>, %arg3: memref<1x8x128xf32, #tpu.memory_space<vmem>>) attributes {dimension_semantics = [#tpu.dimension_semantics<parallel>], iteration_bounds = array<i64: 1>, scalar_prefetch = 0 : i64, scratch_operands = 0 : i64, tpu.core_type = #tpu.core_type<tc>, window_params = [{transform_indices = @transform_0, window_bounds = array<i64: 8, 32>}, {transform_indices = @transform_1, window_bounds = array<i64: 8, 1>}, {transform_indices = @transform_2, window_bounds = array<i64: 1, 8, 128>}]} {
    %c0 = arith.constant 0 : index
    %c0_0 = arith.constant 0 : index
    %0 = vector.load %arg1[%c0, %c0_0] : memref<8x32xf32, #tpu.memory_space<vmem>>, vector<8x32xf32>
    %c0_1 = arith.constant 0 : index
    %c0_2 = arith.constant 0 : index
    %1 = vector.load %arg2[%c0_1, %c0_2] : memref<8x1xi32, #tpu.memory_space<vmem>>, vector<8x1xi32>
    %cst = arith.constant dense<0xFF800000> : vector<8xf32>
    %2 = vector.multi_reduction <maximumf>, %0, %cst [1] : vector<8x32xf32> to vector<8xf32>
    %3 = vector.shape_cast %2 : vector<8xf32> to vector<8x1xf32>
    %4 = vector.broadcast %3 : vector<8x1xf32> to vector<8x32xf32>
    %5 = arith.subf %0, %4 : vector<8x32xf32>
    %6 = math.exp %5 : vector<8x32xf32>
    %cst_3 = arith.constant dense<0.000000e+00> : vector<8xf32>
    %7 = vector.multi_reduction <add>, %6, %cst_3 [1] : vector<8x32xf32> to vector<8xf32>
    %8 = vector.shape_cast %7 : vector<8xf32> to vector<8x1xf32>
    %9 = math.log %8 : vector<8x1xf32>
    %10 = arith.addf %3, %9 : vector<8x1xf32>
    %11 = tpu.iota {dimensions = array<i32: 1>} : vector<8x32xi32>
    %12 = vector.broadcast %1 : vector<8x1xi32> to vector<8x32xi32>
    %13 = arith.cmpi eq, %11, %12 : vector<8x32xi32>
    %cst_4 = arith.constant 0.899999976 : f32
    %cst_5 = arith.constant 3.125000e-03 : f32
    %14 = arith.addf %cst_4, %cst_5 : f32
    %cst_6 = arith.constant 3.125000e-03 : f32
    %15 = vector.broadcast %14 : f32 to vector<8x32xf32>
    %16 = vector.broadcast %cst_6 : f32 to vector<8x32xf32>
    %17 = arith.select %13, %15, %16 : vector<8x32xi1>, vector<8x32xf32>
    %18 = arith.mulf %17, %0 : vector<8x32xf32>
    %cst_7 = arith.constant dense<0.000000e+00> : vector<8xf32>
    %19 = vector.multi_reduction <add>, %18, %cst_7 [1] : vector<8x32xf32> to vector<8xf32>
    %20 = vector.shape_cast %19 : vector<8xf32> to vector<8x1xf32>
    %21 = arith.subf %10, %20 : vector<8x1xf32>
    %c8_i32 = arith.constant 8 : i32
    %22 = arith.muli %arg0, %c8_i32 : i32
    %23 = tpu.iota {dimensions = array<i32: 0>} : vector<8x1xi32>
    %24 = vector.broadcast %22 : i32 to vector<8x1xi32>
    %25 = arith.addi %24, %23 : vector<8x1xi32>
    %c8_i32_8 = arith.constant 8 : i32
    %26 = vector.broadcast %c8_i32_8 : i32 to vector<8x1xi32>
    %27 = arith.cmpi slt, %25, %26 : vector<8x1xi32>
    %cst_9 = arith.constant 0.000000e+00 : f32
    %28 = vector.broadcast %cst_9 : f32 to vector<8x1xf32>
    %29 = arith.select %27, %21, %28 : vector<8x1xi1>, vector<8x1xf32>
    %30 = vector.shape_cast %29 : vector<8x1xf32> to vector<1x8x1xf32>
    %cst_10 = arith.constant dense<0.000000e+00> : vector<1xf32>
    %31 = vector.multi_reduction <add>, %30, %cst_10 [1, 2] : vector<1x8x1xf32> to vector<1xf32>
    %32 = vector.shape_cast %31 : vector<1xf32> to vector<1x1x1xf32>
    %33 = vector.extract %32[0, 0, 0] : f32 from vector<1x1x1xf32>
    %34 = vector.broadcast %33 : f32 to vector<1x8x128xf32>
    %c0_11 = arith.constant 0 : index
    %c0_12 = arith.constant 0 : index
    %c0_13 = arith.constant 0 : index
    %35 = vector.load %arg3[%c0_11, %c0_12, %c0_13] : memref<1x8x128xf32, #tpu.memory_space<vmem>>, vector<1x8x128xf32>
    tpu.vector_store %arg3[%c0_11, %c0_12, %c0_13], %34 {strides = array<i32>} : memref<1x8x128xf32, #tpu.memory_space<vmem>>, vector<1x8x128xf32>,
    return
  }
  func.func @transform_0(%arg0: i32) -> (i32, i32) {
    %c0_i32 = arith.constant 0 : i32
    %c0_i32_0 = arith.constant 0 : i32
    return %arg0, %c0_i32 : i32, i32
  }
  func.func @transform_1(%arg0: i32) -> (i32, i32) {
    %c0_i32 = arith.constant 0 : i32
    %c0_i32_0 = arith.constant 0 : i32
    return %arg0, %c0_i32 : i32, i32
  }
  func.func @transform_2(%arg0: i32) -> (i32, i32, i32) {
    %c0_i32 = arith.constant 0 : i32
    %c0_i32_0 = arith.constant 0 : i32
    %c0_i32_1 = arith.constant 0 : i32
    return %arg0, %c0_i32, %c0_i32_0 : i32, i32, i32
  }
}

</mosaic_0001>

<bundles_post_ra>
// kernel: tpu_custom_call.1
= control target key start
LH: loop header
LB: loop body
LE: loop exit
PB: predicated region body
PF: predicated region fallthrough
CT: control target
= control target key end

     0   :  { %vm14_vm0 = vcmask 261120   ;;  %s146_s0 = inlined_call_operand.vmem [shape: f32[8,32], index: 0, kind: input, shape index: {}]   ;;  %s147_s1 = inlined_call_operand.vmem [shape: s32[8,1], index: 1, kind: input, shape index: {}]   ;;  %s148_s2 = inlined_call_operand.hbm [shape: f32[1,8,128], index: 2, kind: output, shape index: {}]  }
   0x1   :  { %v12_v0 = vld [vmem:[%s146_s0] sm:$0xff] }
   0x2   :  { %7 = vsyncpa [#allocation3], 0  ;;  %v15_v1 = vsel %vm14_vm0, %v12_v0, -inf  ;;  %v107_v2 = vmov 0   ;;  %v13_v3 = vld [vmem:[%s147_s1] sm:$0xff]  ;;  %v27_v6 = vlaneseq  ;;  %vm46_vm2 = vcmask 7168  }
   0x3   :  { %78 = vset.pattern.permute.xlu0 %v107_v2  ;;  %v108_v10 = vmov 0.003125   ;;  %s109_s0 = smov [#allocation2]  }
   0x4   :  { %16 = vmax.xlane.f32.xlu0 %v15_v1  ;;  %v28_v8 = vand.u32 127, %v27_v6  ;;  %s65_s1 = sshll.u32 %s109_s0, 4  ;;  %s66_s1 = int_to_ptr.vmem [resolvable:$true] %s65_s1 }
   0x5   :  { %s83_s14 = scalar_lea.vmem %s66_s1, 128  ;;  %p88_p1 = scmp.lt.s32.totalorder %s66_s1, %s66_s1 }
   0x6   :  { %p84_p0 = scmp.ne.s32.totalorder %s66_s1, %s83_s14  ;;  %p89_p2 = scmp.lt.s32.totalorder %s83_s14, %s83_s14 }
   0x8   :  { %p90_p3 = por %p89_p2, %p88_p1 }
   0xa   :  { %p91_p4 = pnand %p90_p3, %p84_p0 }
  0x1a   :  { %30 = vperm.xlu0 %78, %v13_v3  }
  0x91   :  { %v17_v4 = vpop.xlane.xlu0 %16 }
  0x92   :  { %v18_v5 = vsub.f32 %v12_v0, %v17_v4 }
  0x94   :  { %v19_v7 = vmul.f32 1.442695, %v18_v5 }
  0x96   :  { %79 = vpow2.f32 %v19_v7 }
  0x99   :  { %v31_v9 = vpop.permute.xlu0 %30 }
  0x9a   :  { %vm32_vm1 = vcmp.eq.s32.totalorder %v28_v8, %v31_v9 }
  0x9b   :  { %v33_v11 = vsel %vm32_vm1, 0.903125, %v108_v10 }
  0x9c   :  { %v34_v12 = vmul.f32 %v33_v11, %v12_v0 }
  0x9e   :  { %v35_v15 = vsel %vm14_vm0, %v34_v12, 0.0 }
  0xa0   :  { %v80_v13 = vpop.eup %79 }
  0xa1   :  { %v21_v14 = vsel %vm14_vm0, %v80_v13, 0.0 }
  0xa2   :  { %22 = vadd.xlane.f32.xlu1 %v21_v14 }
  0xa6   :  { %36 = vadd.xlane.f32.xlu1 %v35_v15 }
 0x12f   :  { %v23_v16 = vpop.xlane.xlu1 %22 }
 0x130   :  { %81 = vlog2.f32 %v23_v16 }
 0x133   :  { %v37_v19 = vpop.xlane.xlu1 %36 }
 0x13a   :  { %v82_v17 = vpop.eup %81 }
 0x13b   :  { %v25_v18 = vmul.f32 0.6931472, %v82_v17 }
 0x13d   :  { %v26_v20 = vadd.f32 %v25_v18, %v17_v4 }
 0x13f   :  { %v38_v21 = vsub.f32 %v26_v20, %v37_v19 }
 0x141   :  { %v47_v22 = vsel %vm46_vm2, %v38_v21, 0.0 }
 0x142   :  { %48 = vadd.xlane.f32.xlu1 %v47_v22 }
 0x1cf   :  { %v49_v23 = vpop.xlane.xlu1 %48 }
 0x1d0   :  { %v50_v24 = vrot.slane %v49_v23, 4 }
 0x1d2   :  { %v51_v25 = vadd.f32 %v50_v24, %v49_v23 }
 0x1d4   :  { %v52_v26 = vrot.slane %v51_v25, 2 }
 0x1d6   :  { %v53_v27 = vadd.f32 %v52_v26, %v51_v25 }
 0x1d8   :  { %v54_v28 = vrot.slane %v53_v27, 1 }
 0x1da   :  { %v55_v29 = vadd.f32 %v54_v28, %v53_v27 }
 0x1dc   :  { %73 = vpush %v55_v29 }
 0x20d   :  { %s74_s13 = spop %73 }
 0x20e   :  { %v57_v30 = vstv %s74_s13 }
 0x20f   :  { %58 = vst [vmem:[#allocation2] sm:$0xff] %v57_v30 }
 0x210   :  { %94 = shalt.err (!%p91_p4)
}
 0x211   :  { %s95_s17 = scalar_lea.hbm %s148_s2, 128 }
 0x212   :  { %p96_p5 = scmp.ne.s32.totalorder %s148_s2, %s95_s17  ;;  %p99_p6 = scmp.lt.u32.totalorder %s95_s17, %s148_s2 }
 0x214   :  { %p101_p7 = pnand %p99_p6, %p96_p5 }
 0x216   :  { %104 = shalt.err (!%p101_p7)
}
 0x217   :  { %68 = dma.vmem_to_hbm [thread:$0]  %s66_s1, 128, %s148_s2, [#allocation3]  }
 0x218   :  { %105 = dma.done.wait [#allocation3], 128  }
 0x219   :  { %106 = vsyncadd [#allocation3], 4294967168 }
 0x21a   :  { %72 = vsyncpa [#allocation3], 1 }

</bundles_post_ra>
